<compile_context>
chip_gen: v7x
topology: tpu7x:2x2x1
jax: 0.10.0
libtpu: 0.0.40
codegen_flags: <defaults>
</compile_context>

<pallas_src>
import functools

import jax
import jax.numpy as jnp
from jax.experimental import pallas as pl
from jax.experimental.pallas import tpu as pltpu


# ----------------------------------------------------------------------------
# Single fused kernel:
#   h      = bf16(x) @ Wt_cat + bt                 (bf16 MXU, f32 accumulate)
#   h1     = relu(A_bf16 @ bf16(h @ W1) + b1)      (dropout = identity, eval)
#   emb    = A_bf16 @ bf16(h1 @ W2) + b2           (N, D), f32
#   xm     = emb @ M                               (hoisted out of group loop)
#   scores = xm @ emb^T                            (dense N x N, lane-dense)
#   out[c, g] = scores[gS:(g+1)S, gS:(g+1)S] * lin_w[c] + lin_b[c]
# ----------------------------------------------------------------------------
def fused_gnn_kernel(sample_size, lin_w_ref, lin_b_ref, x_ref, wt_ref, bt_ref,
                     adj_ref, w1_ref, b1_ref, w2_ref, b2_ref, mat_ref,
                     out_ref):
    # Feature transform: cast x to bf16 in-kernel (hidden under the MXU).
    x_bf = x_ref[...].astype(jnp.bfloat16)
    h = (jnp.dot(x_bf, wt_ref[...], preferred_element_type=jnp.float32)
         + bt_ref[...])

    # GCN layer 1 + ReLU.  A_norm matmul is bf16 x bf16, f32 accumulate.
    hw1 = jnp.dot(h, w1_ref[...], preferred_element_type=jnp.float32)
    h1 = jnp.maximum(
        jnp.dot(adj_ref[...], hw1.astype(jnp.bfloat16),
                preferred_element_type=jnp.float32) + b1_ref[...], 0.0)

    # GCN layer 2 -> node embeddings (N, D).
    hw2 = jnp.dot(h1, w2_ref[...], preferred_element_type=jnp.float32)
    emb = (jnp.dot(adj_ref[...], hw2.astype(jnp.bfloat16),
                   preferred_element_type=jnp.float32) + b2_ref[...])

    # Scoring: hoist E @ M once for all nodes, then one dense lane-dense gram
    # (contract last dims of both operands -> no transpose materialized).
    xm = jnp.dot(emb, mat_ref[...], preferred_element_type=jnp.float32)
    scores = jax.lax.dot_general(xm, emb, (((1,), (1,)), ((), ())),
                                 preferred_element_type=jnp.float32)  # (N, N)

    # Per-group scores are the G diagonal (S, S) blocks (static slices).
    g = out_ref.shape[1]
    s = sample_size
    diag = jnp.stack(
        [scores[i * s:(i + 1) * s, i * s:(i + 1) * s] for i in range(g)],
        axis=0)                                                       # (G,S,S)

    # Linear(1, 2): read SMEM scalars once; contiguous per-channel slab writes.
    lw0 = lin_w_ref[0]
    lw1 = lin_w_ref[1]
    lb0 = lin_b_ref[0]
    lb1 = lin_b_ref[1]
    out_ref[0] = diag * lw0 + lb0
    out_ref[1] = diag * lw1 + lb1


def _vmem_limit_bytes(n, k_in, gcn_in, hidden, d, g, s):
    """Size the scoped VMEM limit from the real resident footprint."""
    f32, bf16 = 4, 2
    buffers = (n * k_in * f32                 # x (f32 in VMEM)
               + k_in * gcn_in * bf16         # Wt_cat bf16
               + gcn_in * f32                 # bt
               + n * n * bf16                 # adj bf16
               + gcn_in * hidden * f32 + hidden * f32
               + hidden * d * f32 + d * f32
               + d * d * f32                  # matrix
               + 2 * g * s * s * f32)         # output
    # Traced intermediates, all live simultaneously in the un-gridded kernel.
    inter = (n * k_in * bf16                  # x bf16 copy
             + n * gcn_in * f32               # h
             + n * hidden * (f32 + bf16) * 2  # hw1/h1 (+ bf16 copy)
             + n * d * (f32 + bf16) * 2       # hw2/emb (+ bf16 copy)
             + n * d * f32                    # xm
             + n * n * f32                    # scores
             + 2 * g * s * s * f32)           # diag blocks / channel slabs
    total = buffers + inter
    # v7x has 64 MiB physical VMEM per TensorCore (v5e/v6e: 128 MiB); the
    # whole-graph-resident design must fit the smallest ceiling.
    assert total <= (64 << 20), (
        "resident footprint exceeds v7x VMEM; tile adjacency rows over a "
        "grid (see TODO at top of file)")
    return int(min(64 << 20, max(16 << 20, 2 * total + (4 << 20))))


def gnn_forward_fused(x, wt_bf16, bt, adj_bf16, w1, b1, w2, b2, matrix,
                      lin_w, lin_b, sample_size):
    n = x.shape[0]
    g = n // sample_size
    kernel = functools.partial(fused_gnn_kernel, sample_size)
    vmem = pl.BlockSpec(memory_space=pltpu.MemorySpace.VMEM)
    smem = pl.BlockSpec(memory_space=pltpu.MemorySpace.SMEM)
    vmem_limit = _vmem_limit_bytes(n=n, k_in=x.shape[1], gcn_in=w1.shape[0],
                                   hidden=w1.shape[1], d=w2.shape[1],
                                   g=g, s=sample_size)
    out = pl.pallas_call(
        kernel,
        out_shape=jax.ShapeDtypeStruct((2, g, sample_size, sample_size),
                                       jnp.float32),
        in_specs=[
            smem,   # lin_w (2,)
            smem,   # lin_b (2,)
            vmem,   # x      (N, index_size+768) f32
            vmem,   # Wt_cat (index_size+768, gcn_input) bf16
            vmem,   # bt     (1, gcn_input)
            vmem,   # adj    (N, N) bf16
            vmem,   # W1
            vmem,   # b1
            vmem,   # W2
            vmem,   # b2
            vmem,   # matrix (D, D)
        ],
        out_specs=pl.BlockSpec(memory_space=pltpu.MemorySpace.VMEM),
        compiler_params=pltpu.CompilerParams(vmem_limit_bytes=vmem_limit),
    )(lin_w, lin_b, x, wt_bf16, bt, adj_bf16, w1, b1, w2, b2, matrix)
    # (2, G, S, S) -> (G, S, S, 2) -> (-1, 2)  == torch.stack(ypred).view(-1, 2)
    return jnp.transpose(out, (1, 2, 3, 0)).reshape(-1, 2)


# ----------------------------------------------------------------------------
# Glue: parameter init + preprocessing, dense normalized adjacency, forward.
# ----------------------------------------------------------------------------
def make_params(key, index_size, gcn_input_size, gcn_hidden_size,
                gcn_output_size):
    ks = jax.random.split(key, 12)
    p = {}
    # transform1: Linear(index_size -> gcn_input_size); weight stored transposed.
    p["wt1"] = jax.random.normal(ks[0], (index_size, gcn_input_size),
                                 jnp.float32) * 0.1
    p["bt1"] = jax.random.normal(ks[1], (1, gcn_input_size), jnp.float32) * 0.1
    # transform2: Linear(768 -> gcn_input_size)
    p["wt2"] = jax.random.normal(ks[2], (768, gcn_input_size),
                                 jnp.float32) * 0.02
    p["bt2"] = jax.random.normal(ks[3], (1, gcn_input_size), jnp.float32) * 0.1
    # GCNConv weights
    p["w1"] = jax.random.normal(ks[4], (gcn_input_size, gcn_hidden_size),
                                jnp.float32) * 0.1
    p["b1"] = jax.random.normal(ks[5], (1, gcn_hidden_size), jnp.float32) * 0.1
    p["w2"] = jax.random.normal(ks[6], (gcn_hidden_size, gcn_output_size),
                                jnp.float32) * 0.1
    p["b2"] = jax.random.normal(ks[7], (1, gcn_output_size), jnp.float32) * 0.1
    # self.matrix (gcn_output_size x gcn_output_size)
    p["matrix"] = jax.random.normal(ks[8], (gcn_output_size, gcn_output_size),
                                    jnp.float32)
    # self.linear = Linear(1, 2): weight [2,1] -> flattened (2,), bias (2,)
    p["lin_w"] = jax.random.normal(ks[9], (2,), jnp.float32) * 0.5
    p["lin_b"] = jax.random.normal(ks[10], (2,), jnp.float32) * 0.5
    return p


def preprocess_params(params):
    """Hoist the per-call transform collapse (and bf16 cast) out of forward:
       attr1 @ Wt1 + attr2 @ Wt2  ==  x @ concat([Wt1, Wt2], axis=0)."""
    run = dict(params)
    run["wt_cat"] = jnp.concatenate([params["wt1"], params["wt2"]],
                                    axis=0).astype(jnp.bfloat16)
    run["bt"] = params["bt1"] + params["bt2"]
    return run


def normalized_adjacency(edge_index, num_nodes, dtype=jnp.bfloat16):
    # NOTE: duplicate edges are deduplicated by .set(); if edge_index already
    # contains self-loops the diagonal becomes 2.0 after adding eye (slightly
    # different from PyG gcn_norm).  Fine for the simple test graph here.
    src, dst = edge_index[0], edge_index[1]
    a = jnp.zeros((num_nodes, num_nodes), jnp.float32)
    a = a.at[src, dst].set(1.0)
    a = a + jnp.eye(num_nodes, dtype=jnp.float32)          # add self loops
    deg = jnp.sum(a, axis=1)
    dinv = jax.lax.rsqrt(deg)
    a = dinv[:, None] * a * dinv[None, :]                  # D^-1/2 (A+I) D^-1/2
    return a.astype(dtype)


def gnn_network_forward(x, edge_index, rparams, *, sample_size):
    n = x.shape[0]
    assert n % sample_size == 0, "node rows must be a whole number of groups"
    adj = normalized_adjacency(edge_index, n, dtype=jnp.bfloat16)
    return gnn_forward_fused(x, rparams["wt_cat"], rparams["bt"], adj,
                             rparams["w1"], rparams["b1"],
                             rparams["w2"], rparams["b2"],
                             rparams["matrix"],
                             rparams["lin_w"], rparams["lin_b"],
                             sample_size)


def reference_forward(x, edge_index, params, *, index_size, sample_size):
    """Pure-JAX f32 reference of the PyTorch forward (eval mode)."""
    n = x.shape[0]
    adj = normalized_adjacency(edge_index, n, dtype=jnp.float32)
    h = (x[:, :index_size] @ params["wt1"] + params["bt1"]
         + x[:, index_size:] @ params["wt2"] + params["bt2"])
    h1 = jnp.maximum(adj @ (h @ params["w1"]) + params["b1"], 0.0)
    emb = adj @ (h1 @ params["w2"]) + params["b2"]
    outs = []
    for i in range(n // sample_size):
        e = emb[i * sample_size:(i + 1) * sample_size]
        s = e @ params["matrix"] @ e.T
        o = s[..., None] * params["lin_w"] + params["lin_b"]
        outs.append(o.reshape(-1, 2))
    return jnp.concatenate(outs, axis=0)


if __name__ == "__main__":
    # Small shapes consistent with the module.
    index_size = 8
    gcn_input_size = 32
    gcn_hidden_size = 32
    gcn_output_size = 16
    sample_size = 8
    num_nodes = 16                     # 2 groups of sample_size nodes

    key = jax.random.PRNGKey(0)
    k_x, k_p = jax.random.split(key)

    # data.x: [N, index_size + 768]
    x = jax.random.normal(k_x, (num_nodes, index_size + 768), jnp.float32)

    # data.edge_index: symmetric ring over all nodes, shape [2, E]
    src = jnp.arange(num_nodes, dtype=jnp.int32)
    dst = (src + 1) % num_nodes
    edge_index = jnp.stack([jnp.concatenate([src, dst]),
                            jnp.concatenate([dst, src])], axis=0)

    params = make_params(k_p, index_size, gcn_input_size, gcn_hidden_size,
                         gcn_output_size)
    rparams = preprocess_params(params)

    fwd = jax.jit(functools.partial(gnn_network_forward,
                                    sample_size=sample_size))
    out = fwd(x, edge_index, rparams)
    out = jax.block_until_ready(out)
    assert out.shape == ((num_nodes // sample_size) * sample_size * sample_size, 2)

    # Loose-tolerance check vs the f32 reference (bf16 inputs / f32 accumulate).
    ref = reference_forward(x, edge_index, params,
                            index_size=index_size, sample_size=sample_size)
    max_err = float(jnp.max(jnp.abs(out - ref)))
    assert max_err < 1e-1, f"kernel/reference mismatch, max abs err {max_err}"

    print("KERNEL_OK")
</pallas_src>

<mosaic_0001>
module attributes {stable_mosaic.version = 11 : i64} {
  func.func @fused_gnn_kernel(%arg0: memref<2xf32, #tpu.memory_space<smem>>, %arg1: memref<2xf32, #tpu.memory_space<smem>>, %arg2: memref<16x776xf32, #tpu.memory_space<vmem>>, %arg3: memref<776x32xbf16, #tpu.memory_space<vmem>>, %arg4: memref<1x32xf32, #tpu.memory_space<vmem>>, %arg5: memref<16x16xbf16, #tpu.memory_space<vmem>>, %arg6: memref<32x32xf32, #tpu.memory_space<vmem>>, %arg7: memref<1x32xf32, #tpu.memory_space<vmem>>, %arg8: memref<32x16xf32, #tpu.memory_space<vmem>>, %arg9: memref<1x16xf32, #tpu.memory_space<vmem>>, %arg10: memref<16x16xf32, #tpu.memory_space<vmem>>, %arg11: memref<2x2x8x8xf32, #tpu.memory_space<vmem>>) attributes {dimension_semantics = [], scalar_prefetch = 0 : i64, scratch_operands = 0 : i64, tpu.core_type = #tpu.core_type<tc>} {
    %c0 = arith.constant 0 : index
    %c0_0 = arith.constant 0 : index
    %0 = vector.load %arg2[%c0, %c0_0] : memref<16x776xf32, #tpu.memory_space<vmem>>, vector<16x776xf32>
    %1 = arith.truncf %0 : vector<16x776xf32> to vector<16x776xbf16>
    %c0_1 = arith.constant 0 : index
    %c0_2 = arith.constant 0 : index
    %2 = vector.load %arg3[%c0_1, %c0_2] : memref<776x32xbf16, #tpu.memory_space<vmem>>, vector<776x32xbf16>
    %cst = arith.constant dense<0.000000e+00> : vector<16x32xf32>
    %3 = tpu.matmul %1, %2, %cst {dimension_numbers = #tpu.dot_dimension_numbers<[1], [0], [0], [1], [0, 0, 1, 1], [], []>} : vector<16x776xbf16>, vector<776x32xbf16>, vector<16x32xf32> -> vector<16x32xf32>
    %c0_3 = arith.constant 0 : index
    %c0_4 = arith.constant 0 : index
    %4 = vector.load %arg4[%c0_3, %c0_4] : memref<1x32xf32, #tpu.memory_space<vmem>>, vector<1x32xf32>
    %5 = vector.broadcast %4 : vector<1x32xf32> to vector<16x32xf32>
    %6 = arith.addf %3, %5 : vector<16x32xf32>
    %c0_5 = arith.constant 0 : index
    %c0_6 = arith.constant 0 : index
    %7 = vector.load %arg6[%c0_5, %c0_6] : memref<32x32xf32, #tpu.memory_space<vmem>>, vector<32x32xf32>
    %cst_7 = arith.constant dense<0.000000e+00> : vector<16x32xf32>
    %8 = tpu.matmul %6, %7, %cst_7 {dimension_numbers = #tpu.dot_dimension_numbers<[1], [0], [0], [1], [0, 0, 1, 1], [], []>} : vector<16x32xf32>, vector<32x32xf32>, vector<16x32xf32> -> vector<16x32xf32>
    %c0_8 = arith.constant 0 : index
    %c0_9 = arith.constant 0 : index
    %9 = vector.load %arg5[%c0_8, %c0_9] : memref<16x16xbf16, #tpu.memory_space<vmem>>, vector<16x16xbf16>
    %10 = arith.truncf %8 : vector<16x32xf32> to vector<16x32xbf16>
    %cst_10 = arith.constant dense<0.000000e+00> : vector<16x32xf32>
    %11 = tpu.matmul %9, %10, %cst_10 {dimension_numbers = #tpu.dot_dimension_numbers<[1], [0], [0], [1], [0, 0, 1, 1], [], []>} : vector<16x16xbf16>, vector<16x32xbf16>, vector<16x32xf32> -> vector<16x32xf32>
    %c0_11 = arith.constant 0 : index
    %c0_12 = arith.constant 0 : index
    %12 = vector.load %arg7[%c0_11, %c0_12] : memref<1x32xf32, #tpu.memory_space<vmem>>, vector<1x32xf32>
    %13 = vector.broadcast %12 : vector<1x32xf32> to vector<16x32xf32>
    %14 = arith.addf %11, %13 : vector<16x32xf32>
    %cst_13 = arith.constant 0.000000e+00 : f32
    %15 = vector.broadcast %cst_13 : f32 to vector<16x32xf32>
    %16 = arith.maximumf %14, %15 : vector<16x32xf32>
    %c0_14 = arith.constant 0 : index
    %c0_15 = arith.constant 0 : index
    %17 = vector.load %arg8[%c0_14, %c0_15] : memref<32x16xf32, #tpu.memory_space<vmem>>, vector<32x16xf32>
    %cst_16 = arith.constant dense<0.000000e+00> : vector<16x16xf32>
    %18 = tpu.matmul %16, %17, %cst_16 {dimension_numbers = #tpu.dot_dimension_numbers<[1], [0], [0], [1], [0, 0, 1, 1], [], []>} : vector<16x32xf32>, vector<32x16xf32>, vector<16x16xf32> -> vector<16x16xf32>
    %c0_17 = arith.constant 0 : index
    %c0_18 = arith.constant 0 : index
    %19 = vector.load %arg5[%c0_17, %c0_18] : memref<16x16xbf16, #tpu.memory_space<vmem>>, vector<16x16xbf16>
    %20 = arith.truncf %18 : vector<16x16xf32> to vector<16x16xbf16>
    %cst_19 = arith.constant dense<0.000000e+00> : vector<16x16xf32>
    %21 = tpu.matmul %19, %20, %cst_19 {dimension_numbers = #tpu.dot_dimension_numbers<[1], [0], [0], [1], [0, 0, 1, 1], [], []>} : vector<16x16xbf16>, vector<16x16xbf16>, vector<16x16xf32> -> vector<16x16xf32>
    %c0_20 = arith.constant 0 : index
    %c0_21 = arith.constant 0 : index
    %22 = vector.load %arg9[%c0_20, %c0_21] : memref<1x16xf32, #tpu.memory_space<vmem>>, vector<1x16xf32>
    %23 = vector.broadcast %22 : vector<1x16xf32> to vector<16x16xf32>
    %24 = arith.addf %21, %23 : vector<16x16xf32>
    %c0_22 = arith.constant 0 : index
    %c0_23 = arith.constant 0 : index
    %25 = vector.load %arg10[%c0_22, %c0_23] : memref<16x16xf32, #tpu.memory_space<vmem>>, vector<16x16xf32>
    %cst_24 = arith.constant dense<0.000000e+00> : vector<16x16xf32>
    %26 = tpu.matmul %24, %25, %cst_24 {dimension_numbers = #tpu.dot_dimension_numbers<[1], [0], [0], [1], [0, 0, 1, 1], [], []>} : vector<16x16xf32>, vector<16x16xf32>, vector<16x16xf32> -> vector<16x16xf32>
    %cst_25 = arith.constant dense<0.000000e+00> : vector<16x16xf32>
    %27 = tpu.matmul %26, %24, %cst_25 {dimension_numbers = #tpu.dot_dimension_numbers<[1], [1], [0], [0], [0, 0, 1, 0], [], []>} : vector<16x16xf32>, vector<16x16xf32>, vector<16x16xf32> -> vector<16x16xf32>
    %28 = vector.extract_strided_slice %27 {offsets = [0, 0], sizes = [8, 8], strides = [1, 1]} : vector<16x16xf32> to vector<8x8xf32>
    %29 = vector.extract_strided_slice %27 {offsets = [8, 8], sizes = [8, 8], strides = [1, 1]} : vector<16x16xf32> to vector<8x8xf32>
    %30 = vector.shape_cast %28 : vector<8x8xf32> to vector<1x8x8xf32>
    %31 = vector.shape_cast %29 : vector<8x8xf32> to vector<1x8x8xf32>
    %32 = tpu.concatenate %30, %31 in 0 : vector<1x8x8xf32>, vector<1x8x8xf32> -> vector<2x8x8xf32>
    %c0_26 = arith.constant 0 : index
    %33 = memref.load %arg0[%c0_26] : memref<2xf32, #tpu.memory_space<smem>>
    %c1 = arith.constant 1 : index
    %34 = memref.load %arg0[%c1] : memref<2xf32, #tpu.memory_space<smem>>
    %c0_27 = arith.constant 0 : index
    %35 = memref.load %arg1[%c0_27] : memref<2xf32, #tpu.memory_space<smem>>
    %c1_28 = arith.constant 1 : index
    %36 = memref.load %arg1[%c1_28] : memref<2xf32, #tpu.memory_space<smem>>
    %37 = vector.broadcast %33 : f32 to vector<2x8x8xf32>
    %38 = arith.mulf %32, %37 : vector<2x8x8xf32>
    %39 = vector.broadcast %35 : f32 to vector<2x8x8xf32>
    %40 = arith.addf %38, %39 : vector<2x8x8xf32>
    %c0_29 = arith.constant 0 : index
    %c0_30 = arith.constant 0 : index
    %c0_31 = arith.constant 0 : index
    %c0_32 = arith.constant 0 : index
    %41 = vector.load %arg11[%c0_29, %c0_30, %c0_31, %c0_32] : memref<2x2x8x8xf32, #tpu.memory_space<vmem>>, vector<1x2x8x8xf32>
    %42 = vector.shape_cast %41 : vector<1x2x8x8xf32> to vector<2x8x8xf32>
    %43 = vector.shape_cast %40 : vector<2x8x8xf32> to vector<1x2x8x8xf32>
    tpu.vector_store %arg11[%c0_29, %c0_30, %c0_31, %c0_32], %43 {strides = array<i32>} : memref<2x2x8x8xf32, #tpu.memory_space<vmem>>, vector<1x2x8x8xf32>,
    %44 = vector.broadcast %34 : f32 to vector<2x8x8xf32>
    %45 = arith.mulf %32, %44 : vector<2x8x8xf32>
    %46 = vector.broadcast %36 : f32 to vector<2x8x8xf32>
    %47 = arith.addf %45, %46 : vector<2x8x8xf32>
    %c1_33 = arith.constant 1 : index
    %c0_34 = arith.constant 0 : index
    %c0_35 = arith.constant 0 : index
    %c0_36 = arith.constant 0 : index
    %48 = vector.load %arg11[%c1_33, %c0_34, %c0_35, %c0_36] : memref<2x2x8x8xf32, #tpu.memory_space<vmem>>, vector<1x2x8x8xf32>
    %49 = vector.shape_cast %48 : vector<1x2x8x8xf32> to vector<2x8x8xf32>
    %50 = vector.shape_cast %47 : vector<2x8x8xf32> to vector<1x2x8x8xf32>
    tpu.vector_store %arg11[%c1_33, %c0_34, %c0_35, %c0_36], %50 {strides = array<i32>} : memref<2x2x8x8xf32, #tpu.memory_space<vmem>>, vector<1x2x8x8xf32>,
    return
  }
}

</mosaic_0001>

<bundles_post_ra>
// kernel: gnn_network_forward.1
= control target key start
LH: loop header
LB: loop body
LE: loop exit
PB: predicated region body
PF: predicated region fallthrough
CT: control target
= control target key end

     0   :  { %16 = vsyncpa [#allocation3], 0  ;;  %s1794_s0 = inlined_call_operand.vmem [shape: f32[2], index: 0, kind: input, shape index: {}]   ;;  %s1795_s1 = inlined_call_operand.vmem [shape: f32[2], index: 1, kind: input, shape index: {}]   ;;  %s1796_s2 = inlined_call_operand.vmem [shape: f32[16,776], index: 2, kind: input, shape index: {}]   ;;  %s1797_s3 = inlined_call_operand.vmem [shape: bf16[776,32], index: 3, kind: input, shape index: {}]   ;;  %s1798_s4 = inlined_call_operand.vmem [shape: f32[1,32], index: 4, kind: input, shape index: {}]   ;;  %s1799_s5 = inlined_call_operand.vmem [shape: bf16[16,16], index: 5, kind: input, shape index: {}]   ;;  %s1800_s6 = inlined_call_operand.vmem [shape: f32[32,32], index: 6, kind: input, shape index: {}]   ;;  %s1801_s7 = inlined_call_operand.vmem [shape: f32[1,32], index: 7, kind: input, shape index: {}]   ;;  %s1802_s8 = inlined_call_operand.vmem [shape: f32[32,16], index: 8, kind: input, shape index: {}]   ;;  %s1803_s9 = inlined_call_operand.vmem [shape: f32[1,16], index: 9, kind: input, shape index: {}]   ;;  %s1804_s10 = inlined_call_operand.vmem [shape: f32[16,16], index: 10, kind: input, shape index: {}]   ;;  %s1805_s11 = inlined_call_operand.vmem [shape: f32[2,2,8,8], index: 11, kind: output, shape index: {}]  }
   0x1   :  { %s24_s19 = sshll.u32 %s1794_s0, 4  ;;  %s25_s19 = int_to_ptr.vmem [resolvable:$true] %s24_s19 }
   0x2   :  { %17 = vsyncpa [#allocation5], 0  ;;  %s34_s22 = sshll.u32 %s1795_s1, 4  ;;  %s1426_s23 = scalar_lea.vmem %s25_s19, 16  ;;  %s35_s22 = int_to_ptr.vmem [resolvable:$true] %s34_s22 }
   0x3   :  { %p1427_p0 = scmp.ne.s32.totalorder %s25_s19, %s1426_s23  ;;  %p1431_p1 = scmp.lt.s32.totalorder %s25_s19, %s25_s19 }
   0x4   :  { %p1432_p2 = scmp.lt.s32.totalorder %s1426_s23, %s1426_s23 }
   0x6   :  { %p1433_p3 = por %p1432_p2, %p1431_p1 }
   0x8   :  { %p1434_p4 = pnand %p1433_p3, %p1427_p0 }
   0xa   :  { %1437 = shalt.err (!%p1434_p4)
}
   0xb   :  { %s1454_s24 = smov [#allocation2]   ;;  %s1438_s25 = scalar_lea.vmem %s35_s22, 16 }
   0xc   :  { %27 = dma.vmem_to_smem %s25_s19, 16, %s1454_s24, [#allocation3]  }
   0xd   :  { %p1439_p5 = scmp.ne.s32.totalorder %s35_s22, %s1438_s25  ;;  %p1443_p6 = scmp.lt.s32.totalorder %s35_s22, %s35_s22 }
   0xe   :  { %p1444_p7 = scmp.lt.s32.totalorder %s1438_s25, %s1438_s25 }
  0x10   :  { %p1445_p8 = por %p1444_p7, %p1443_p6 }
  0x12   :  { %p1446_p9 = pnand %p1445_p8, %p1439_p5 }
  0x14   :  { %1449 = shalt.err (!%p1446_p9)
}
  0x15   :  { %s1455_s0 = smov [#allocation4]  }
  0x16   :  { %37 = dma.vmem_to_smem %s35_s22, 16, %s1455_s0, [#allocation5]  }
  0x17   :  { %1450 = dma.done.wait [#allocation3], 16  }
  0x18   :  { %1451 = vsyncadd [#allocation3], 4294967280 }
  0x19   :  { %1452 = dma.done.wait [#allocation5], 16  }
  0x1a   :  { %1453 = vsyncadd [#allocation5], 4294967280 }
  0x1b   :  { %62 = sfence }
  0x1c   :  { %v1376_v0 = vld [vmem:[%s1797_s3 + $0x40] sm:$0xff]   ;;  %v1380_v4 = vld [vmem:[%s1797_s3 + $0x48] sm:$0xff]   ;;  %v1384_v8 = vld [vmem:[%s1797_s3 + $0x50] sm:$0xff]   ;;  %v1456_v43 = vmov 0.0   ;;  %vm1457_vm0 = vmmov 0   ;;  %vm484_vm1 = vcmask 1043456  }
  0x1d   :  { %v1377_v1 = vld [vmem:[%s1797_s3] sm:$0xff]   ;;  %1199 = vmatprep.subr.bf16.mxu0 %v1376_v0  ;;  %v1381_v5 = vld [vmem:[%s1797_s3 + $0x8] sm:$0xff]   ;;  %v1385_v9 = vld [vmem:[%s1797_s3 + $0x10] sm:$0xff]   ;;  %vm480_vm2 = vcmask 64512   ;;  %vm656_vm3 = vcmask 261120   ;;  %vm753_vm4 = vcmask 130048  }
  0x1e   :  { %v1378_v2 = vld [vmem:[%s1797_s3 + $0xc0] sm:$0xff]   ;;  %1200 = vmatpush3.bf16.msra.mxu0 %v1377_v1  ;;  %v1382_v6 = vld [vmem:[%s1797_s3 + $0xc8] sm:$0xff]   ;;  %v1386_v10 = vld [vmem:[%s1797_s3 + $0xd0] sm:$0xff]   ;;  %s1104_s1 = sld [smem:[#allocation4]]  ;;  %s1196_s26 = sld [smem:[#allocation4 + $0x1]] }
  0x1f   :  { %v1379_v3 = vld [vmem:[%s1797_s3 + $0x80] sm:$0xff]   ;;  %1221 = vmatprep.subr.bf16.mxu1 %v1378_v2  ;;  %1201 = vmatprep.subr.bf16.mxu0 %v1380_v4  ;;  %v1383_v7 = vld [vmem:[%s1797_s3 + $0x88] sm:$0xff]   ;;  %v1387_v11 = vld [vmem:[%s1797_s3 + $0x90] sm:$0xff]   ;;  %s1458_s27 = smov 120  }
  0x20   :  { %1222 = vmatpush3.bf16.msra.mxu1 %v1379_v3  ;;  %v1388_v12 = vld [vmem:[%s1797_s3 + $0x58] sm:$0xff]   ;;  %v1392_v16 = vld [vmem:[%s1797_s3 + $0x60] sm:$0xff]   ;;  %v1396_v20 = vld [vmem:[%s1797_s3 + $0x68] sm:$0xff]  }
  0x21   :  { %1223 = vmatprep.subr.bf16.mxu1 %v1382_v6  ;;  %v1389_v13 = vld [vmem:[%s1797_s3 + $0x18] sm:$0xff]   ;;  %v1393_v17 = vld [vmem:[%s1797_s3 + $0x20] sm:$0xff]   ;;  %v1397_v21 = vld [vmem:[%s1797_s3 + $0x28] sm:$0xff]  }
  0x22   :  { %1202 = vmatpush3.bf16.msra.mxu0 %v1381_v5  ;;  %v1390_v14 = vld [vmem:[%s1797_s3 + $0xd8] sm:$0xff]   ;;  %v1394_v18 = vld [vmem:[%s1797_s3 + $0xe0] sm:$0xff]   ;;  %v1398_v22 = vld [vmem:[%s1797_s3 + $0xe8] sm:$0xff]  }
  0x23   :  { %1203 = vmatprep.subr.bf16.mxu0 %v1384_v8  ;;  %v1391_v15 = vld [vmem:[%s1797_s3 + $0x98] sm:$0xff]   ;;  %v1395_v19 = vld [vmem:[%s1797_s3 + $0xa0] sm:$0xff]   ;;  %v1399_v23 = vld [vmem:[%s1797_s3 + $0xa8] sm:$0xff]  }
  0x24   :  { %1224 = vmatpush3.bf16.msra.mxu1 %v1383_v7  ;;  %v1400_v24 = vld [vmem:[%s1797_s3 + $0x70] sm:$0xff]   ;;  %v1404_v28 = vld [vmem:[%s1797_s3 + $0x78] sm:$0xff]   ;;  %v65_v31 = vld [vmem:[%s1796_s2 + $0x8] sm:$0xff] }
  0x25   :  { %1225 = vmatprep.subr.bf16.mxu1 %v1386_v10  ;;  %v1401_v25 = vld [vmem:[%s1797_s3 + $0x30] sm:$0xff]   ;;  %v1405_v29 = vld [vmem:[%s1797_s3 + $0x38] sm:$0xff]   ;;  %v72_v32 = vld [vmem:[%s1796_s2 + $0x40] sm:$0xff] }
  0x26   :  { %1204 = vmatpush3.bf16.msra.mxu0 %v1385_v9  ;;  %v1402_v26 = vld [vmem:[%s1797_s3 + $0xf0] sm:$0xff]   ;;  %v1406_v30 = vld [vmem:[%s1797_s3 + $0xf8] sm:$0xff]   ;;  %v79_v33 = vpack.c.bf16 %v72_v32, %v65_v31  ;;  %v64_v35 = vld [vmem:[%s1796_s2] sm:$0xff] }
  0x27   :  { %1205 = vmatprep.subr.bf16.mxu0 %v1388_v12  ;;  %v1403_v27 = vld [vmem:[%s1797_s3 + $0xb0] sm:$0xff]   ;;  %v1407_v34 = vld [vmem:[%s1797_s3 + $0xb8] sm:$0xff]   ;;  %v1408_v38 = vld [vmem:[%s1797_s3 + $0x140] sm:$0xff]  }
  0x28   :  { %1226 = vmatpush3.bf16.msra.mxu1 %v1387_v11  ;;  %v71_v36 = vld [vmem:[%s1796_s2 + $0x38] sm:$0xff]  ;;  %520 = vmatprep.mubr.bf16.mxu0 %v79_v33  ;;  %v74_v40 = vld [vmem:[%s1796_s2 + $0x50] sm:$0xff]  ;;  %v1409_v42 = vld [vmem:[%s1797_s3 + $0x100] sm:$0xff]  }
  0x29   :  { %1227 = vmatprep.subr.bf16.mxu1 %v1390_v14  ;;  %v78_v37 = vpack.c.bf16 %v71_v36, %v64_v35  ;;  %v67_v39 = vld [vmem:[%s1796_s2 + $0x18] sm:$0xff]  ;;  %v66_v44 = vld [vmem:[%s1796_s2 + $0x10] sm:$0xff]  ;;  %v73_v45 = vld [vmem:[%s1796_s2 + $0x48] sm:$0xff] }
  0x2a   :  { %1206 = vmatpush3.bf16.msra.mxu0 %v1389_v13  ;;  %v81_v41 = vpack.c.bf16 %v74_v40, %v67_v39  ;;  %v80_v46 = vpack.c.bf16 %v73_v45, %v66_v44  ;;  %v1410_v47 = vld [vmem:[%s1797_s3 + $0x148] sm:$0xff]   ;;  %v1412_v49 = vld [vmem:[%s1797_s3 + $0x150] sm:$0xff]   ;;  %v1414_v51 = vld [vmem:[%s1797_s3 + $0x158] sm:$0xff]  }
  0x2b   :  { %1207 = vmatprep.subr.bf16.mxu0 %v1392_v16  ;;  %v1411_v48 = vld [vmem:[%s1797_s3 + $0x108] sm:$0xff]   ;;  %v1413_v50 = vld [vmem:[%s1797_s3 + $0x110] sm:$0xff]   ;;  %v1415_v52 = vld [vmem:[%s1797_s3 + $0x118] sm:$0xff]  }
  0x2c   :  { %1228 = vmatpush3.bf16.msra.mxu1 %v1391_v15  ;;  %561 = vmatprep.mubr.bf16.mxu1 %v81_v41  ;;  %v1416_v53 = vld [vmem:[%s1797_s3 + $0x160] sm:$0xff]   ;;  %v1418_v55 = vld [vmem:[%s1797_s3 + $0x168] sm:$0xff]   ;;  %v70_v61 = vld [vmem:[%s1796_s2 + $0x30] sm:$0xff] }
  0x2d   :  { %1229 = vmatprep.subr.bf16.mxu1 %v1394_v18  ;;  %v1417_v54 = vld [vmem:[%s1797_s3 + $0x120] sm:$0xff]   ;;  %v69_v57 = vld [vmem:[%s1796_s2 + $0x28] sm:$0xff]  ;;  %v1420_v0 = vld [vmem:[%s1797_s3 + $0x170] sm:$0xff]  }
  0x2e   :  { %1208 = vmatpush3.bf16.msra.mxu0 %v1393_v17  ;;  %v1424_v56 = vld [vmem:[%s1797_s3 + $0x180] ss:$0 sps:$4 sm:$0xff]   ;;  %v1419_v59 = vld [vmem:[%s1797_s3 + $0x128] sm:$0xff]   ;;  %v1421_v2 = vld [vmem:[%s1797_s3 + $0x130] sm:$0xff]  }
  0x2f   :  { %1209 = vmatprep.subr.bf16.mxu0 %v1396_v20  ;;  %v76_v58 = vld [vmem:[%s1796_s2 + $0x60] sm:$0xff]  ;;  %v486_v62 = vsel %vm484_vm1, %v1424_v56, 0  ;;  %v77_v63 = vld [vmem:[%s1796_s2 + $0x68] sm:$0xff]  ;;  %v1422_v3 = vld [vmem:[%s1797_s3 + $0x178] sm:$0xff]  }
  0x30   :  { %1230 = vmatpush3.bf16.msra.mxu1 %v1395_v19  ;;  %v83_v60 = vpack.c.bf16 %v76_v58, %v69_v57  ;;  %v84_v1 = vpack.c.bf16 %v77_v63, %v70_v61  ;;  %v1423_v4 = vld [vmem:[%s1797_s3 + $0x138] sm:$0xff]   ;;  %v68_v5 = vld [vmem:[%s1796_s2 + $0x20] sm:$0xff]  ;;  %v653_v9 = vld [vmem:[%s1800_s6 + $0x8] sm:$0xff] }
  0x31   :  { %1231 = vmatprep.subr.bf16.mxu1 %v1398_v22  ;;  %v75_v6 = vld [vmem:[%s1796_s2 + $0x58] sm:$0xff]  ;;  %v652_v8 = vld [vmem:[%s1800_s6] sm:$0xff]  ;;  %v654_v11 = vld [vmem:[%s1800_s6 + $0x10] sm:$0xff] }
  0x32   :  { %1210 = vmatpush3.bf16.msra.mxu0 %v1397_v21  ;;  %v82_v7 = vpack.c.bf16 %v75_v6, %v68_v5  ;;  %v1345_v10 = vpack.c.bf16 %v653_v9, %v652_v8  ;;  %v655_v12 = vld [vmem:[%s1800_s6 + $0x18] sm:$0xff]  ;;  %v1129_v15 = vld [vmem:[%s1798_s4] ss:$0 sm:$0xff]  ;;  %vm1366_vm5 = vmpackc.low %vm753_vm4, %vm753_vm4 }
  0x33   :  { %1211 = vmatprep.subr.bf16.mxu0 %v1400_v24  ;;  %v1349_v13 = vpack.c.bf16 %v655_v12, %v654_v11  ;;  %v1182_v56 = vld [vmem:[%s1801_s7] ss:$0 sm:$0xff] }
  0x34   :  { %1232 = vmatpush3.bf16.msra.mxu1 %v1399_v23 }
  0x35   :  { %1233 = vmatprep.subr.bf16.mxu1 %v1402_v26 }
  0x36   :  { %1212 = vmatpush3.bf16.msra.mxu0 %v1401_v25 }
  0x37   :  { %1213 = vmatprep.subr.bf16.mxu0 %v1404_v28 }
  0x38   :  { %1234 = vmatpush3.bf16.msra.mxu1 %v1403_v27 }
  0x39   :  { %1235 = vmatprep.subr.bf16.mxu1 %v1406_v30 }
  0x3a   :  { %1214 = vmatpush3.bf16.msra.mxu0 %v1405_v29 }
  0x3b   :  { %1243 = vmatprep.subr.bf16.mxu0 %v1408_v38 }
  0x3c   :  { %1236 = vmatpush3.bf16.msra.mxu1 %v1407_v34 }
  0x3d   :  { %1291 = vmatprep.subr.bf16.mxu1 %v1456_v43  ;;  %521 = vmatmul.mubr.bf16.vlgmr.msra.gmra.mrb[0].mxu0 %v78_v37 }
  0x3e   :  { %1244 = vmatpush3.bf16.msra.mxu0 %v1409_v42  ;;  %602 = vmatprep.mubr.bf16.mxu0 %v83_v60 }
  0x3f   :  { %562 = vmatmul.mubr.bf16.vlgmr.msra.gmra.mrb[0].mxu1 %v80_v46  ;;  %1245 = vmatprep.subr.bf16.mxu0 %v1410_v47  ;;  %v800_v46 = vld [vmem:[%s1802_s8] sm:$0xff]  ;;  %v801_v47 = vld [vmem:[%s1802_s8 + $0x8] sm:$0xff] }
  0x40   :  { %1293 = vmatprep.mubr.msk.bf16.mxu1 %vm1457_vm0, %v1456_v43  ;;  %1292 = vmatpush3.bf16.msra.mxu1 %v486_v62 }
  0x41   :  { %1346 = vmatprep.subr.bf16.mxu1 %v1345_v10 }
  0x42   :  { %1246 = vmatpush3.bf16.msra.mxu0 %v1411_v48 }
  0x43   :  { %1247 = vmatprep.subr.bf16.mxu0 %v1412_v49 }
  0x46   :  { %1248 = vmatpush3.bf16.msra.mxu0 %v1413_v50  ;;  %v1353_v50 = vpack.c.bf16 %v801_v47, %v800_v46 }
  0x47   :  { %1249 = vmatprep.subr.bf16.mxu0 %v1414_v51  ;;  %1294 = vmatmul.mubr.msk.bf16.vlgmr.msra.gmra.mrb[4].mxu1 %vm480_vm2, %v84_v1  ;;  %v934_v1 = vld [vmem:[%s1804_s10] sm:$0xff] }
  0x48   :  { %1348 = vmatpush3.bf16.msra.mxu1 %v1345_v10 }
  0x49   :  { %1350 = vmatprep.subr.bf16.mxu1 %v1349_v13 }
  0x4a   :  { %1250 = vmatpush3.bf16.msra.mxu0 %v1415_v52  ;;  %v1425_v52 = vld [vmem:[%s1799_s5] sm:$0xff]  }
  0x4b   :  { %1251 = vmatprep.subr.bf16.mxu0 %v1416_v53  ;;  %v802_v53 = vld [vmem:[%s1802_s8 + $0x10] sm:$0xff] }
  0x4c   :  { %1352 = vmatpush3.bf16.msra.mxu1 %v1349_v13 }
  0x4d   :  { %1308 = vmatprep.subr.bf16.mxu1 %v1456_v43 }
  0x4e   :  { %1252 = vmatpush3.bf16.msra.mxu0 %v1417_v54  ;;  %v803_v54 = vld [vmem:[%s1802_s8 + $0x18] sm:$0xff] }
  0x4f   :  { %1253 = vmatprep.subr.bf16.mxu0 %v1418_v55  ;;  %v1357_v55 = vpack.c.bf16 %v803_v54, %v802_v53 }
  0x52   :  { %1254 = vmatpush3.bf16.msra.mxu0 %v1419_v59 }
  0x53   :  { %1255 = vmatprep.subr.bf16.mxu0 %v1420_v0 }
  0x56   :  { %1256 = vmatpush3.bf16.msra.mxu0 %v1421_v2  ;;  %v935_v2 = vld [vmem:[%s1804_s10 + $0x8] sm:$0xff]  ;;  %s1195_s10 = sld [smem:[#allocation2 + $0x1]] }
  0x57   :  { %1257 = vmatprep.subr.bf16.mxu0 %v1422_v3  ;;  %v1361_v3 = vpack.c.bf16 %v935_v2, %v934_v1 }
  0x5a   :  { %1258 = vmatpush3.bf16.msra.mxu0 %v1423_v4 }
  0x5b   :  { %1362 = vmatprep.subr.bf16.mxu0 %v1361_v3 }
  0x5d   :  { %603 = vmatmul.mubr.bf16.vlgmr.msra.gmra.mrb[4].mxu0 %v82_v7 }
  0x5e   :  { %1364 = vmatpush3.bf16.msra.mxu0 %v1361_v3 }
 0x110   :  { %v1215_v14 = vpop.f32.mrb[0].mxu0 }
 0x111   :  { %v1216_v16 = vpop.f32.mrb[1].mxu0 }
 0x112   :  { %v1217_v17 = vadd.f32 %v1216_v16, %v1215_v14  ;;  %v1218_v18 = vpop.f32.mrb[2].mxu0  ;;  %v1237_v19 = vpop.f32.mrb[0].mxu1 }
 0x113   :  { %v1219_v20 = vpop.f32.mrb[3].mxu0  ;;  %v1238_v23 = vpop.f32.mrb[1].mxu1 }
 0x114   :  { %v523_v21 = vadd.f32 %v1217_v17, %v1129_v15  ;;  %v1220_v22 = vadd.f32 %v1219_v20, %v1218_v18  ;;  %v1239_v24 = vadd.f32 %v1238_v23, %v1237_v19  ;;  %v1240_v25 = vpop.f32.mrb[2].mxu1  ;;  %v1114_v17 = vstv %s1195_s10 }
 0x115   :  { %v1241_v27 = vpop.f32.mrb[3].mxu1  ;;  %v1109_v20 = vstv %s1104_s1 }
 0x116   :  { %v526_v26 = vadd.f32 %v1220_v22, %v1129_v15  ;;  %v564_v28 = vadd.f32 %v1239_v24, %v523_v21  ;;  %v1242_v29 = vadd.f32 %v1241_v27, %v1240_v25  ;;  %v1117_v21 = vstv %s1196_s26 }
 0x118   :  { %v567_v30 = vadd.f32 %v1242_v29, %v526_v26 }
 0x11a   :  { %v645_v31 = vpop.f32.mrb[4].mxu1 }
 0x11b   :  { %v1295_v32 = vpop.f32.mrb[5].mxu1 }
 0x11c   :  { %v648_v33 = vpop.f32.mrb[6].mxu1 }
 0x11d   :  { %v1296_v34 = vpop.f32.mrb[7].mxu1 }
 0x130   :  { %v1259_v35 = vpop.f32.mrb[4].mxu0 }
 0x131   :  { %v1260_v36 = vpop.f32.mrb[5].mxu0 }
 0x132   :  { %v1261_v37 = vadd.f32 %v1260_v36, %v1259_v35  ;;  %v1262_v38 = vpop.f32.mrb[6].mxu0 }
 0x133   :  { %v1263_v39 = vpop.f32.mrb[7].mxu0 }
 0x134   :  { %v605_v40 = vadd.f32 %v1261_v37, %v564_v28  ;;  %v1264_v41 = vadd.f32 %v1263_v39, %v1262_v38 }
 0x136   :  { %v646_v42 = vadd.f32 %v645_v31, %v605_v40  ;;  %v608_v44 = vadd.f32 %v1264_v41, %v567_v30 }
 0x138   :  { %v649_v45 = vadd.f32 %v648_v33, %v608_v44  ;;  %1305 = vmatprep.mubr.msk.f32.mxu1 %vm656_vm3, %v646_v42 }
 0x13a   :  { %1306 = vmatmul.mubr.msk.f32.vlgmr.msra.gmra.mrb[8].mxu1 %vm656_vm3, %v649_v45 }
 0x13b   :  { %1310 = vmatprep.mubr.msk.bf16.mxu1 %vm1457_vm0, %v1456_v43 }
 0x20d   :  { %v1307_v48 = vpop.f32.mrb[8].mxu1 }
 0x20e   :  { %v729_v49 = vpop.f32.mrb[9].mxu1 }
 0x20f   :  { %v740_v51 = vpack.c.bf16 %v1307_v48, %v729_v49 }
 0x211   :  { %1309 = vmatpush3.bf16.msra.mxu1 %v740_v51 }
 0x212   :  { %1354 = vmatprep.subr.bf16.mxu1 %v1353_v50 }
 0x214   :  { %1311 = vmatmul.mubr.msk.bf16.vlgmr.msra.gmra.mrb[12].mxu1 %vm753_vm4, %v1425_v52 }
 0x215   :  { %1356 = vmatpush3.bf16.msra.mxu1 %v1353_v50 }
 0x216   :  { %1358 = vmatprep.subr.bf16.mxu1 %v1357_v55 }
 0x219   :  { %1360 = vmatpush3.bf16.msra.mxu1 %v1357_v55 }
 0x21a   :  { %1325 = vmatprep.subr.bf16.mxu1 %v1456_v43 }
 0x2e7   :  { %v791_v57 = vpop.f32.mrb[12].mxu1 }
 0x2e8   :  { %v792_v58 = vadd.f32 %v1182_v56, %v791_v57  ;;  %v1312_v59 = vpop.f32.mrb[13].mxu1 }
 0x2e9   :  { %v794_v60 = vpop.f32.mrb[14].mxu1 }
 0x2ea   :  { %v798_v61 = vmax.f32 %v792_v58, 0.0  ;;  %v795_v62 = vadd.f32 %v1182_v56, %v794_v60  ;;  %v1313_v63 = vpop.f32.mrb[15].mxu1 }
 0x2ec   :  { %v799_v0 = vmax.f32 %v795_v62, 0.0  ;;  %1322 = vmatprep.mubr.msk.f32.mxu1 %vm656_vm3, %v798_v61 }
 0x2ee   :  { %1323 = vmatmul.mubr.msk.f32.vlgmr.msra.gmra.mrb[10].mxu1 %vm656_vm3, %v799_v0 }
 0x2ef   :  { %1327 = vmatprep.mubr.msk.bf16.mxu1 %vm1457_vm0, %v1456_v43  ;;  %v1187_v43 = vld [vmem:[%s1803_s9] ss:$0 sm:$0xff]  ;;  %s1102_s9 = sld [smem:[#allocation2]] }
 0x2f5   :  { %v1106_v16 = vstv %s1102_s9 }
 0x3c1   :  { %v1324_v4 = vpop.f32.mrb[10].mxu1 }
 0x3c2   :  { %v876_v5 = vpop.f32.mrb[11].mxu1 }
 0x3c3   :  { %v885_v6 = vpack.c.bf16 %v1324_v4, %v876_v5 }
 0x3c5   :  { %1326 = vmatpush3.bf16.msra.mxu1 %v885_v6 }
 0x3c8   :  { %1328 = vmatmul.mubr.msk.bf16.vlgmr.msra.gmra.mrb[16].mxu1 %vm753_vm4, %v1425_v52 }
 0x49b   :  { %v927_v7 = vpop.f32.mrb[16].mxu1 }
 0x49c   :  { %v928_v8 = vadd.f32 %v1187_v43, %v927_v7  ;;  %v1329_v9 = vpop.f32.mrb[17].mxu1 }
 0x49d   :  { %v930_v10 = vpop.f32.mrb[18].mxu1 }
 0x49e   :  { %v931_v11 = vadd.f32 %v1187_v43, %v930_v10  ;;  %v1330_v12 = vpop.f32.mrb[19].mxu1  ;;  %1335 = vmatprep.mubr.msk.f32.mxu0 %vm753_vm4, %v928_v8 }
 0x4a0   :  { %v1365_v13 = vpack.c.bf16 %v931_v11, %v928_v8  ;;  %1336 = vmatmul.mubr.msk.f32.vlgmr.msra.gmra.mrb[8].mxu0 %vm753_vm4, %v931_v11 }
 0x4a2   :  { %1367 = vmatprep.subr.msk.bf16.mxu1 %vm1366_vm5, %v1365_v13 }
 0x4a3   :  { %1370 = vmatpush3.bf16.xpose.msk.msra.mxu1 %vm1366_vm5, %v1365_v13 }
 0x573   :  { %v1337_v14 = vpop.f32.mrb[8].mxu0 }
 0x574   :  { %v1008_v15 = vpop.f32.mrb[9].mxu0 }
 0x575   :  { %1342 = vmatprep.mubr.msk.f32.mxu1 %vm753_vm4, %v1008_v15 }
 0x576   :  { %1343 = vmatmul.mubr.msk.f32.vlgmr.msra.gmra.mrb[20].mxu1 %vm753_vm4, %v1337_v14 }
 0x649   :  { %v1344_v18 = vpop.f32.mrb[20].mxu1 }
 0x64a   :  { %v1089_v19 = vpop.f32.mrb[21].mxu1  ;;  %1099 = vrot.lane.b32.xlu0 %v1344_v18, %s1458_s27 }
 0x64b   :  { %v1107_v22 = vmul.f32 %v1106_v16, %v1089_v19  ;;  %v1115_v23 = vmul.f32 %v1114_v17, %v1089_v19 }
 0x64d   :  { %v1110_v24 = vadd.f32 %v1109_v20, %v1107_v22  ;;  %v1118_v25 = vadd.f32 %v1117_v21, %v1115_v23 }
 0x64f   :  { %1112 = vst.msk [vmem:[%s1805_s11] sm:$0xff] %vm480_vm2, %v1110_v24  ;;  %1197 = vst.msk [vmem:[%s1805_s11 + $0x10] sm:$0xff] %vm480_vm2, %v1118_v25 }
 0x6bc   :  { %v1100_v26 = vpop.permute.xlu0 %1099 }
 0x6bd   :  { %v1108_v27 = vmul.f32 %v1106_v16, %v1100_v26  ;;  %v1116_v28 = vmul.f32 %v1114_v17, %v1100_v26 }
 0x6bf   :  { %v1111_v29 = vadd.f32 %v1109_v20, %v1108_v27  ;;  %v1119_v30 = vadd.f32 %v1117_v21, %v1116_v28 }
 0x6c1   :  { %1113 = vst.msk [vmem:[%s1805_s11 + $0x8] sm:$0xff] %vm480_vm2, %v1111_v29  ;;  %1198 = vst.msk [vmem:[%s1805_s11 + $0x18] sm:$0xff] %vm480_vm2, %v1119_v30 }
 0x6c2   :  { %1127 = vsyncpa [#allocation3], 1 }
 0x6c3   :  { %1128 = vsyncpa [#allocation5], 1 }

</bundles_post_ra>
